<compile_context>
chip_gen: v5e
topology: v5e:2x2
jax: 0.10.0
libtpu: 0.0.40
codegen_flags: <defaults>
</compile_context>

<pallas_src>
import functools

import jax
import jax.numpy as jnp
from jax.experimental import pallas as pl
from jax.experimental.pallas import tpu as pltpu

PAD_IDX = 0


def _round_up(x, m):
    return ((x + m - 1) // m) * m


def _choose_row_tile(n_tokens, vocab, itemsize, min_rows, target_block_bytes=2 << 20):
    """Pick a row tile giving ~target_block_bytes of logits per block."""
    rt = max(min_rows, target_block_bytes // max(1, vocab * itemsize))
    rt = (rt // min_rows) * min_rows          # multiple of the dtype's min sublane tile
    rt = min(rt, 2048)                        # cap for tiny vocabs (review guidance)
    n_ceil = _round_up(n_tokens, min_rows)
    rt = min(rt, n_ceil)                      # never bigger than the (rounded) input
    # balance tiles so the padded remainder is at most min_rows-ish rows
    num_tiles = (n_ceil + rt - 1) // rt
    rt = _round_up((n_ceil + num_tiles - 1) // num_tiles, min_rows)
    return max(rt, min_rows)


def _ce_kernel(logits_ref, target_ref, loss_ref, valid_ref,
               *, label_smoothing, pad_idx, row_tile):
    """Per-tile cross-entropy: writes per-row masked loss and valid mask."""
    i = pl.program_id(0)
    start = pl.multiple_of(i * row_tile, row_tile)

    # logits arrive in their storage dtype (f32 or bf16); all math in f32.
    logits = logits_ref[...].astype(jnp.float32)            # (TN, V)
    tgt = target_ref[pl.ds(start, row_tile), :]              # (TN, 1) int32, VMEM-resident

    v = logits.shape[-1]

    # stable log-sum-exp over classes (lane axis)
    m = jnp.max(logits, axis=-1, keepdims=True)               # (TN, 1)
    lse = jnp.log(jnp.sum(jnp.exp(logits - m), axis=-1, keepdims=True)) + m

    # gather logit at target index via (1, V) iota compare (TPU-friendly gather)
    class_ids = jax.lax.broadcasted_iota(jnp.int32, (1, v), 1)
    onehot = class_ids == tgt                                  # (TN, V) via broadcast
    tgt_logit = jnp.sum(jnp.where(onehot, logits, 0.0), axis=-1, keepdims=True)

    nll = lse - tgt_logit                                      # -log p[target]
    if label_smoothing != 0.0:
        # mean over classes of -log p[c] = lse - mean(logits)
        smooth = lse - jnp.mean(logits, axis=-1, keepdims=True)
        per_row = (1.0 - label_smoothing) * nll + label_smoothing * smooth
    else:
        per_row = nll

    valid = (tgt != pad_idx).astype(jnp.float32)               # (TN, 1)

    loss_ref[...] = per_row * valid
    valid_ref[...] = valid


def translational_loss(logits, target, *, label_smoothing=0.0,
                       pad_idx=PAD_IDX, row_tile=None):
    """Equivalent of TransationalLoss(label_smoothing)(logits, target)."""
    vocab = logits.shape[-1]
    logits2 = logits.reshape(-1, vocab)            # keep input dtype (bf16 stays bf16)
    target2 = target.reshape(-1).astype(jnp.int32)
    n = logits2.shape[0]

    itemsize = jnp.dtype(logits2.dtype).itemsize
    min_rows = max(8, 32 // itemsize)              # f32 -> 8, bf16 -> 16, 8-bit -> 32
    if row_tile is None:
        row_tile = _choose_row_tile(n, vocab, itemsize, min_rows)
    else:
        row_tile = _round_up(int(row_tile), min_rows)

    # Pad N up to a tile multiple; padded rows get target == pad_idx so the valid
    # mask removes them from both the loss sum and the token count.
    n_pad = _round_up(n, row_tile)
    if n_pad != n:
        logits2 = jnp.pad(logits2, ((0, n_pad - n), (0, 0)))
        target2 = jnp.pad(target2, (0, n_pad - n), constant_values=pad_idx)
    target2 = target2.reshape(-1, 1)

    kernel = functools.partial(_ce_kernel,
                               label_smoothing=float(label_smoothing),
                               pad_idx=int(pad_idx),
                               row_tile=int(row_tile))

    loss_rows, valid_rows = pl.pallas_call(
        kernel,
        out_shape=(jax.ShapeDtypeStruct((n_pad, 1), jnp.float32),
                   jax.ShapeDtypeStruct((n_pad, 1), jnp.float32)),
        grid_spec=pltpu.PrefetchScalarGridSpec(
            num_scalar_prefetch=0,
            grid=(n_pad // row_tile,),
            in_specs=[
                # big lane-dense logits tiles (double-buffered by Pallas)
                pl.BlockSpec((row_tile, vocab), lambda i: (i, 0)),
                # whole target array resident in VMEM (tiny), sliced in-kernel
                pl.BlockSpec(memory_space=pltpu.MemorySpace.VMEM),
            ],
            out_specs=[
                pl.BlockSpec((row_tile, 1), lambda i: (i, 0)),
                pl.BlockSpec((row_tile, 1), lambda i: (i, 0)),
            ],
        ),
        compiler_params=pltpu.CompilerParams(
            # no cross-step accumulator -> safe to shard across TensorCores (v7x)
            dimension_semantics=("parallel",),
            vmem_limit_bytes=32 << 20,   # >> 2 * 2 MiB blocks; within every gen's VMEM
        ),
    )(logits2, target2)

    total = jnp.sum(loss_rows)
    count = jnp.sum(valid_rows)
    # count == 0 (all tokens ignored) yields NaN, matching torch.nn.CrossEntropyLoss.
    return total / count


def _reference_loss(logits, target, label_smoothing=0.0, pad_idx=PAD_IDX):
    """Pure-JAX reference mirroring torch.nn.CrossEntropyLoss semantics."""
    vocab = logits.shape[-1]
    lg = logits.reshape(-1, vocab).astype(jnp.float32)
    tg = target.reshape(-1).astype(jnp.int32)
    logp = jax.nn.log_softmax(lg, axis=-1)
    nll = -jnp.take_along_axis(logp, tg[:, None], axis=-1)[:, 0]
    smooth = -jnp.mean(logp, axis=-1)
    per = (1.0 - label_smoothing) * nll + label_smoothing * smooth
    valid = (tg != pad_idx).astype(jnp.float32)
    return jnp.sum(per * valid) / jnp.sum(valid)


if __name__ == "__main__":
    key = jax.random.PRNGKey(0)
    k1, k2 = jax.random.split(key)

    batch, seq, vocab = 2, 12, 32
    logits = jax.random.normal(k1, (batch, seq, vocab), dtype=jnp.float32)
    target = jax.random.randint(k2, (batch, seq), 0, vocab, dtype=jnp.int32)
    # force a couple of PAD_IDX tokens so the ignore_index path is exercised
    target = target.at[0, 0].set(PAD_IDX).at[1, 3].set(PAD_IDX)

    # 1) f32 logits, no label smoothing, auto tile
    out = jax.block_until_ready(translational_loss(logits, target, label_smoothing=0.0))
    ref = _reference_loss(logits, target, label_smoothing=0.0)
    assert jnp.allclose(out, ref, rtol=1e-5, atol=1e-5), (out, ref)

    # 2) f32 logits, label smoothing, forced multi-tile + remainder padding (n=24, tile=16)
    out_s = jax.block_until_ready(
        translational_loss(logits, target, label_smoothing=0.1, row_tile=16))
    ref_s = _reference_loss(logits, target, label_smoothing=0.1)
    assert jnp.allclose(out_s, ref_s, rtol=1e-5, atol=1e-5), (out_s, ref_s)

    # 3) bf16 logits: DMA'd as bf16 (half HBM traffic), f32 math inside the kernel
    logits_bf16 = logits.astype(jnp.bfloat16)
    out_b = jax.block_until_ready(translational_loss(logits_bf16, target))
    ref_b = _reference_loss(logits_bf16, target)
    assert jnp.allclose(out_b, ref_b, rtol=1e-4, atol=1e-4), (out_b, ref_b)

    print("KERNEL_OK")
</pallas_src>

<mosaic_0001>
module attributes {stable_mosaic.version = 11 : i64} {
  func.func @_ce_kernel(%arg0: i32, %arg1: memref<24x32xf32, #tpu.memory_space<vmem>>, %arg2: memref<24x1xi32, #tpu.memory_space<vmem>>, %arg3: memref<24x1xf32, #tpu.memory_space<vmem>>, %arg4: memref<24x1xf32, #tpu.memory_space<vmem>>) attributes {dimension_semantics = [#tpu.dimension_semantics<parallel>], iteration_bounds = array<i64: 1>, scalar_prefetch = 0 : i64, scratch_operands = 0 : i64, tpu.core_type = #tpu.core_type<tc>, window_params = [{transform_indices = @transform_0, window_bounds = array<i64: 24, 32>}, {pipeline_mode = #tpu.pipeline_mode<synchronous>, transform_indices = @transform_1, window_bounds = array<i64: 24, 1>}, {transform_indices = @transform_2, window_bounds = array<i64: 24, 1>}, {transform_indices = @transform_3, window_bounds = array<i64: 24, 1>}]} {
    %c24_i32 = arith.constant 24 : i32
    %0 = arith.muli %arg0, %c24_i32 : i32
    %1 = tpu.assume_multiple %0, 24 : i32
    %c0 = arith.constant 0 : index
    %c0_0 = arith.constant 0 : index
    %2 = vector.load %arg1[%c0, %c0_0] : memref<24x32xf32, #tpu.memory_space<vmem>>, vector<24x32xf32>
    %3 = arith.index_cast %1 : i32 to index
    %c0_1 = arith.constant 0 : index
    %4 = vector.load %arg2[%3, %c0_1] : memref<24x1xi32, #tpu.memory_space<vmem>>, vector<24x1xi32>
    %cst = arith.constant dense<0xFF800000> : vector<24xf32>
    %5 = vector.multi_reduction <maximumf>, %2, %cst [1] : vector<24x32xf32> to vector<24xf32>
    %6 = vector.shape_cast %5 : vector<24xf32> to vector<24x1xf32>
    %7 = vector.broadcast %6 : vector<24x1xf32> to vector<24x32xf32>
    %8 = arith.subf %2, %7 : vector<24x32xf32>
    %9 = math.exp %8 : vector<24x32xf32>
    %cst_2 = arith.constant dense<0.000000e+00> : vector<24xf32>
    %10 = vector.multi_reduction <add>, %9, %cst_2 [1] : vector<24x32xf32> to vector<24xf32>
    %11 = vector.shape_cast %10 : vector<24xf32> to vector<24x1xf32>
    %12 = math.log %11 : vector<24x1xf32>
    %13 = arith.addf %12, %6 : vector<24x1xf32>
    %14 = tpu.iota {dimensions = array<i32: 1>} : vector<1x32xi32>
    %15 = vector.broadcast %14 : vector<1x32xi32> to vector<24x32xi32>
    %16 = vector.broadcast %4 : vector<24x1xi32> to vector<24x32xi32>
    %17 = arith.cmpi eq, %15, %16 : vector<24x32xi32>
    %cst_3 = arith.constant 0.000000e+00 : f32
    %18 = vector.broadcast %cst_3 : f32 to vector<24x32xf32>
    %19 = arith.select %17, %2, %18 : vector<24x32xi1>, vector<24x32xf32>
    %cst_4 = arith.constant dense<0.000000e+00> : vector<24xf32>
    %20 = vector.multi_reduction <add>, %19, %cst_4 [1] : vector<24x32xf32> to vector<24xf32>
    %21 = vector.shape_cast %20 : vector<24xf32> to vector<24x1xf32>
    %22 = arith.subf %13, %21 : vector<24x1xf32>
    %c0_i32 = arith.constant 0 : i32
    %23 = vector.broadcast %c0_i32 : i32 to vector<24x1xi32>
    %24 = arith.cmpi ne, %4, %23 : vector<24x1xi32>
    %25 = arith.extui %24 : vector<24x1xi1> to vector<24x1xi32>
    %26 = arith.sitofp %25 : vector<24x1xi32> to vector<24x1xf32>
    %27 = arith.mulf %22, %26 : vector<24x1xf32>
    %c0_5 = arith.constant 0 : index
    %c0_6 = arith.constant 0 : index
    %28 = vector.load %arg3[%c0_5, %c0_6] : memref<24x1xf32, #tpu.memory_space<vmem>>, vector<24x1xf32>
    tpu.vector_store %arg3[%c0_5, %c0_6], %27 {strides = array<i32>} : memref<24x1xf32, #tpu.memory_space<vmem>>, vector<24x1xf32>,
    %c0_7 = arith.constant 0 : index
    %c0_8 = arith.constant 0 : index
    %29 = vector.load %arg4[%c0_7, %c0_8] : memref<24x1xf32, #tpu.memory_space<vmem>>, vector<24x1xf32>
    tpu.vector_store %arg4[%c0_7, %c0_8], %26 {strides = array<i32>} : memref<24x1xf32, #tpu.memory_space<vmem>>, vector<24x1xf32>,
    return
  }
  func.func @transform_0(%arg0: i32) -> (i32, i32) {
    %c0_i32 = arith.constant 0 : i32
    %c0_i32_0 = arith.constant 0 : i32
    return %arg0, %c0_i32 : i32, i32
  }
  func.func @transform_1(%arg0: i32) -> (i32, i32) {
    %c0_i32 = arith.constant 0 : i32
    %c0_i32_0 = arith.constant 0 : i32
    %c0_i32_1 = arith.constant 0 : i32
    return %c0_i32, %c0_i32_0 : i32, i32
  }
  func.func @transform_2(%arg0: i32) -> (i32, i32) {
    %c0_i32 = arith.constant 0 : i32
    %c0_i32_0 = arith.constant 0 : i32
    return %arg0, %c0_i32 : i32, i32
  }
  func.func @transform_3(%arg0: i32) -> (i32, i32) {
    %c0_i32 = arith.constant 0 : i32
    %c0_i32_0 = arith.constant 0 : i32
    return %arg0, %c0_i32 : i32, i32
  }
}

</mosaic_0001>

<bundles_post_ra>
// kernel: tpu_custom_call.1
= control target key start
LH: loop header
LB: loop body
LE: loop exit
PB: predicated region body
PF: predicated region fallthrough
CT: control target
= control target key end

     0   :  { %vm21_vm0 = vcmask 261120   ;;  %v134_v2 = vmov 0   ;;  %vm99_vm2 = vcmask 7168   ;;  %v135_v6 = vmov 0.0   ;;  %s211_s0 = inlined_call_operand.vmem [shape: f32[24,32], index: 0, kind: input, shape index: {}]   ;;  %s212_s1 = inlined_call_operand.vmem [shape: s32[24,1], index: 1, kind: input, shape index: {}]   ;;  %s213_s3 = inlined_call_operand.vmem [shape: f32[24,1], index: 3, kind: output, shape index: {1}]   ;;  %s214_s2 = inlined_call_operand.vmem [shape: f32[24,1], index: 2, kind: output, shape index: {0}]  }
   0x1   :  { %v14_v0 = vld [vmem:[%s211_s0] sm:$0xff]  ;;  %v16_v1 = vld [vmem:[%s211_s0 + $0x10] sm:$0xff]  ;;  %119 = vset.pattern.permute.xlu1 %v134_v2  ;;  %120 = vset.pattern.permute.xlu2 %v134_v2  ;;  %v19_v5 = vld [vmem:[%s212_s1 + $0x8] sm:$0xff]  ;;  %v58_v12 = vlaneseq }
   0x2   :  { %v22_v3 = vsel %vm21_vm0, %v14_v0, -inf  ;;  %v28_v4 = vsel %vm21_vm0, %v16_v1, -inf  ;;  %121 = vset.pattern.permute.xlu0 %v134_v2  ;;  %vm88_vm1 = vcmp.ne.s32.totalorder %v19_v5, 0  ;;  %64 = vperm.xlu2 %120, %v19_v5   ;;  %v15_v8 = vld [vmem:[%s211_s0 + $0x8] sm:$0xff]  ;;  %v20_v10 = vld [vmem:[%s212_s1 + $0x10] sm:$0xff]  ;;  %v18_v11 = vld [vmem:[%s212_s1] sm:$0xff] }
   0x3   :  { %23 = vmax.xlane.f32.xlu0 %v22_v3  ;;  %29 = vmax.xlane.f32.xlu1 %v28_v4  ;;  %v167_v7 = vsel %vm88_vm1, 1.0, %v135_v6  ;;  %v25_v9 = vsel %vm21_vm0, %v15_v8, -inf  ;;  %v59_v13 = vand.u32 127, %v58_v12  ;;  %vm87_vm6 = vcmp.ne.s32.totalorder %v18_v11, 0 }
   0x4   :  { %104 = vst.msk [vmem:[%s213_s3 + $0x8] sm:$0xff] %vm99_vm2, %v167_v7  ;;  %v114_v38 = vsel %vm87_vm6, 1.0, %v135_v6  ;;  %vm89_vm7 = vcmp.ne.s32.totalorder %v20_v10, 0 }
   0x5   :  { %103 = vst.msk [vmem:[%s213_s3] sm:$0xff] %vm99_vm2, %v114_v38  ;;  %v116_v39 = vsel %vm89_vm7, 1.0, %v135_v6 }
   0x6   :  { %105 = vst.msk [vmem:[%s213_s3 + $0x10] sm:$0xff] %vm99_vm2, %v116_v39 }
   0xa   :  { %67 = vperm.xlu2 %120, %v20_v10  }
   0xb   :  { %26 = vmax.xlane.f32.xlu0 %v25_v9 }
  0x1c   :  { %61 = vperm.xlu1 %119, %v18_v11  }
  0x5c   :  { %v65_v14 = vpop.permute.xlu2 %64 }
  0x5d   :  { %vm70_vm3 = vcmp.eq.s32.totalorder %v59_v13, %v65_v14 }
  0x5e   :  { %v73_v15 = vsel %vm70_vm3, %v15_v8, 0.0 }
  0x5f   :  { %v78_v16 = vsel %vm21_vm0, %v73_v15, 0.0 }
  0x60   :  { %79 = vadd.xlane.f32.xlu1 %v78_v16 }
  0x64   :  { %v68_v34 = vpop.permute.xlu2 %67 }
  0x65   :  { %vm71_vm5 = vcmp.eq.s32.totalorder %v59_v13, %v68_v34 }
  0x66   :  { %v74_v36 = vsel %vm71_vm5, %v16_v1, 0.0 }
  0x67   :  { %v81_v37 = vsel %vm21_vm0, %v74_v36, 0.0 }
  0x76   :  { %v24_v17 = vpop.xlane.xlu0 %23  ;;  %v30_v18 = vpop.xlane.xlu1 %29 }
  0x77   :  { %v31_v19 = vsub.f32 %v14_v0, %v24_v17  ;;  %v33_v21 = vsub.f32 %v16_v1, %v30_v18 }
  0x79   :  { %v34_v20 = vmul.f32 1.442695, %v31_v19  ;;  %v38_v22 = vmul.f32 1.442695, %v33_v21 }
  0x7b   :  { %122 = vpow2.f32 %v34_v20 }
  0x7c   :  { %124 = vpow2.f32 %v38_v22 }
  0x7e   :  { %v27_v23 = vpop.xlane.xlu0 %26 }
  0x7f   :  { %v32_v24 = vsub.f32 %v15_v8, %v27_v23 }
  0x81   :  { %v123_v25 = vpop.eup %122  ;;  %v36_v26 = vmul.f32 1.442695, %v32_v24 }
  0x82   :  { %v40_v27 = vsel %vm21_vm0, %v123_v25, 0.0  ;;  %v125_v28 = vpop.eup %124 }
  0x83   :  { %126 = vpow2.f32 %v36_v26  ;;  %41 = vadd.xlane.f32.xlu0 %v40_v27  ;;  %v46_v30 = vsel %vm21_vm0, %v125_v28, 0.0 }
  0x89   :  { %v127_v29 = vpop.eup %126 }
  0x8a   :  { %v43_v31 = vsel %vm21_vm0, %v127_v29, 0.0 }
  0x8b   :  { %47 = vadd.xlane.f32.xlu0 %v46_v30  ;;  %44 = vadd.xlane.f32.xlu2 %v43_v31 }
  0x8e   :  { %v62_v32 = vpop.permute.xlu1 %61 }
  0x8f   :  { %vm69_vm4 = vcmp.eq.s32.totalorder %v59_v13, %v62_v32 }
  0x90   :  { %v72_v33 = vsel %vm69_vm4, %v14_v0, 0.0 }
  0x91   :  { %v75_v35 = vsel %vm21_vm0, %v72_v33, 0.0 }
  0x93   :  { %76 = vadd.xlane.f32.xlu0 %v75_v35 }
  0x9b   :  { %82 = vadd.xlane.f32.xlu0 %v81_v37 }
  0xd3   :  { %v80_v53 = vpop.xlane.xlu1 %79 }
  0xf6   :  { %v42_v40 = vpop.xlane.xlu0 %41 }
  0xf7   :  { %128 = vlog2.f32 %v42_v40 }
  0xfd   :  { %v129_v41 = vpop.eup %128 }
  0xfe   :  { %v45_v42 = vpop.xlane.xlu2 %44  ;;  %v48_v43 = vpop.xlane.xlu0 %47  ;;  %v50_v44 = vmul.f32 0.6931472, %v129_v41 }
  0xff   :  { %130 = vlog2.f32 %v45_v42 }
 0x100   :  { %132 = vlog2.f32 %v48_v43  ;;  %v55_v46 = vadd.f32 %v50_v44, %v24_v17 }
 0x105   :  { %v131_v45 = vpop.eup %130 }
 0x106   :  { %v133_v47 = vpop.eup %132  ;;  %v52_v48 = vmul.f32 0.6931472, %v131_v45  ;;  %v77_v49 = vpop.xlane.xlu0 %76 }
 0x107   :  { %v84_v50 = vsub.f32 %v55_v46, %v77_v49  ;;  %v54_v52 = vmul.f32 0.6931472, %v133_v47 }
 0x108   :  { %v56_v51 = vadd.f32 %v52_v48, %v27_v23 }
 0x109   :  { %v96_v54 = vmul.f32 %v114_v38, %v84_v50  ;;  %v57_v57 = vadd.f32 %v54_v52, %v30_v18 }
 0x10a   :  { %v85_v55 = vsub.f32 %v56_v51, %v80_v53 }
 0x10b   :  { %100 = vst.msk [vmem:[%s214_s2] sm:$0xff] %vm99_vm2, %v96_v54 }
 0x10c   :  { %v97_v56 = vmul.f32 %v167_v7, %v85_v55 }
 0x10e   :  { %101 = vst.msk [vmem:[%s214_s2 + $0x8] sm:$0xff] %vm99_vm2, %v97_v56  ;;  %v83_v58 = vpop.xlane.xlu0 %82 }
 0x10f   :  { %v86_v59 = vsub.f32 %v57_v57, %v83_v58 }
 0x111   :  { %v98_v60 = vmul.f32 %v116_v39, %v86_v59 }
 0x113   :  { %102 = vst.msk [vmem:[%s214_s2 + $0x10] sm:$0xff] %vm99_vm2, %v98_v60 }

</bundles_post_ra>
